<compile_context>
chip_gen: v5e
topology: v5e:2x2
jax: 0.10.0
libtpu: 0.0.40
codegen_flags: <defaults>
</compile_context>

<pallas_src>
import functools

import jax
import jax.numpy as jnp
from jax.experimental import pallas as pl
from jax.experimental.pallas import tpu as pltpu


# Per-input VMEM tile budget: 2 inputs x 2 pipeline buffers x 8 MiB = 32 MiB
# (+ tiny weights / accumulator), comfortably under the 48 MiB scoped-VMEM
# request on every generation, including v7x's 64 MiB physical VMEM per TC.
_TILE_BUDGET_BYTES = 8 << 20
_VMEM_LIMIT_BYTES = 48 << 20


def ssp_kernel(x_ref, y_ref, w1_ref, b1_ref, w2_ref, b2_ref, out_ref, acc_ref,
               *, inv_hw, hw, hw_tile):
    # x_ref, y_ref: (b_tile, C, hw_tile) — channels on sublane, spatial on lane.
    # w1_ref: (C, 8), b1_ref: (1, 8), w2_ref: (8, 1), b2_ref: (1, 1)
    # acc_ref: (b_tile, C) f32 accumulator of the spatial sum of (x - y).
    k = pl.program_id(1)

    @pl.when(k == 0)
    def _init():
        acc_ref[...] = jnp.zeros_like(acc_ref)

    # mean(x) - mean(y) == mean(x - y): accumulate one difference-sum per tile.
    # Upcast to f32 so bf16 inputs can be DMA'd directly (no host-side astype).
    diff = x_ref[...].astype(jnp.float32) - y_ref[...].astype(jnp.float32)
    if hw % hw_tile != 0:
        # Ragged spatial tail: zero out lanes past the valid extent so the
        # unspecified block-padding never contaminates the reduction.
        lane = jax.lax.broadcasted_iota(jnp.int32, diff.shape, dimension=diff.ndim - 1)
        diff = jnp.where(k * hw_tile + lane < hw, diff, 0.0)
    acc_ref[...] += jnp.sum(diff, axis=-1)

    @pl.when(k == pl.num_programs(1) - 1)
    def _finalize():
        d = jnp.abs(acc_ref[...]) * inv_hw                      # (b_tile, C)
        # Linear(128 -> 8) + ReLU
        h = jnp.dot(d, w1_ref[...], preferred_element_type=jnp.float32) + b1_ref[...]
        h = jnp.maximum(h, 0.0)                                 # (b_tile, 8)
        # Linear(8 -> 1) + Sigmoid
        o = jnp.dot(h, w2_ref[...], preferred_element_type=jnp.float32) + b2_ref[...]
        out_ref[...] = jax.nn.sigmoid(o)                        # (b_tile, 1)


def _choose_tiles(B, C, HW, itemsize, budget=_TILE_BUDGET_BYTES):
    """Pick (b_tile, hw_tile) for (b_tile, C, hw_tile) input blocks.

    Layout rule: the last two block dims must be multiples of (8, 128) or equal
    the full array extent.  C = 128 always satisfies the sublane rule (also for
    bf16's 16-row packing); hw_tile and — via the (b_tile, 1) output block —
    b_tile are chosen to satisfy the rest.  Ragged edges use pl.cdiv grids.
    """
    bytes_per_batch = C * HW * itemsize
    min_b = B if B < 8 else 8          # B < 8 uses the full-dim exemption

    # Preferred: whole spatial axis per block (nk == 1).  In NCHW the
    # (b_tile, C, HW) slab is one fully contiguous HBM run per DMA and the
    # reduction grid axis (accumulator revisits, per-step overhead) disappears.
    if min_b * bytes_per_batch <= budget:
        if B < 8:
            return B, HW
        max_b = max(8, (budget // bytes_per_batch) // 8 * 8)
        if B >= 16:
            # Keep >= 2 batch tiles so v7x's second TensorCore gets work.
            max_b = min(max_b, max(8, (B // 2) // 8 * 8))
        b_tile = max(8, min(max_b, (B // 8) * 8))
        return b_tile, HW

    # Spatial tiling needed: minimum legal batch rows, maximum contiguous lane
    # run (DMA contiguity is set by hw_tile * itemsize, not by b_tile).
    b_tile = min_b
    hw_cap = budget // (b_tile * C * itemsize)
    hw_tile = max(128, (hw_cap // 128) * 128)
    hw_tile = min(hw_tile, pl.cdiv(HW, 128) * 128)
    return b_tile, hw_tile


def ssp_forward(x, y, w1, b1, w2, b2):
    """x, y: (B, C, H, W) NCHW (PyTorch convention), C = 128. Returns (B, 1) f32.

    Inputs may be f32 or bf16; they are streamed as-is (no host-side cast)."""
    B, C, H, W = x.shape
    assert y.shape == x.shape and C == 128
    HW = H * W

    # Free views of contiguous NCHW — no extra HBM pass, no host transpose.
    x3 = x.reshape(B, C, HW)
    y3 = y.reshape(B, C, HW)
    w1f = w1.astype(jnp.float32)
    b1f = b1.reshape(1, 8).astype(jnp.float32)
    w2f = w2.astype(jnp.float32)
    b2f = b2.reshape(1, 1).astype(jnp.float32)

    itemsize = x3.dtype.itemsize
    b_tile, hw_tile = _choose_tiles(B, C, HW, itemsize)
    nb = pl.cdiv(B, b_tile)
    nk = pl.cdiv(HW, hw_tile)

    kernel = functools.partial(ssp_kernel, inv_hw=1.0 / float(HW),
                               hw=HW, hw_tile=hw_tile)

    cost = pl.CostEstimate(
        flops=2 * B * C * HW + 2 * B * C * 8 + 2 * B * 8,
        transcendentals=B,
        bytes_accessed=2 * B * C * HW * itemsize + 4 * B + 4 * (C * 8 + 8 + 8 + 1),
    )

    # NOTE: default double-buffering is kept (no pl.Buffered(3)); with ~8 MiB
    # per-input blocks a third buffer would exceed the 48 MiB VMEM request.
    return pl.pallas_call(
        kernel,
        out_shape=jax.ShapeDtypeStruct((B, 1), jnp.float32),
        grid=(nb, nk),  # batch tiles (parallel), spatial reduction last (arbitrary)
        in_specs=[
            pl.BlockSpec((b_tile, C, hw_tile), lambda b, k: (b, 0, k)),
            pl.BlockSpec((b_tile, C, hw_tile), lambda b, k: (b, 0, k)),
            pl.BlockSpec((C, 8), lambda b, k: (0, 0)),   # weights: constant blocks,
            pl.BlockSpec((1, 8), lambda b, k: (0, 0)),   # stay resident in VMEM
            pl.BlockSpec((8, 1), lambda b, k: (0, 0)),
            pl.BlockSpec((1, 1), lambda b, k: (0, 0)),
        ],
        out_specs=pl.BlockSpec((b_tile, 1), lambda b, k: (b, 0)),
        scratch_shapes=[pltpu.VMEM((b_tile, C), jnp.float32)],
        compiler_params=pltpu.CompilerParams(
            dimension_semantics=("parallel", "arbitrary"),
            vmem_limit_bytes=_VMEM_LIMIT_BYTES),
        cost_estimate=cost,
    )(x3, y3, w1f, b1f, w2f, b2f)


def init_params(key):
    """Deterministic synthetic init matching nn.Linear(128,8) and nn.Linear(8,1)."""
    k1, k2, k3, k4 = jax.random.split(key, 4)
    # PyTorch Linear stores weight as (out, in); we keep (in, out) for x @ W.
    bound1 = 1.0 / jnp.sqrt(128.0)
    w1 = jax.random.uniform(k1, (128, 8), jnp.float32, -bound1, bound1)
    b1 = jax.random.uniform(k2, (8,), jnp.float32, -bound1, bound1)
    bound2 = 1.0 / jnp.sqrt(8.0)
    w2 = jax.random.uniform(k3, (8, 1), jnp.float32, -bound2, bound2)
    b2 = jax.random.uniform(k4, (1,), jnp.float32, -bound2, bound2)
    return w1, b1, w2, b2


if __name__ == "__main__":
    key = jax.random.PRNGKey(0)
    kx, ky, kp = jax.random.split(key, 3)
    w1, b1, w2, b2 = init_params(kp)

    def reference(x, y):
        px = jnp.mean(x.astype(jnp.float32), axis=(2, 3))
        py = jnp.mean(y.astype(jnp.float32), axis=(2, 3))
        d = jnp.abs(px - py)
        return jax.nn.sigmoid(jnp.maximum(d @ w1 + b1, 0.0) @ w2 + b2)

    # Primary small-shape check (C must be 128 — dc_linear input features).
    B, C, H, W = 2, 128, 8, 8
    x = jax.random.normal(kx, (B, C, H, W), jnp.float32)
    y = jax.random.normal(ky, (B, C, H, W), jnp.float32)
    metric = ssp_forward(x, y, w1, b1, w2, b2)
    jax.block_until_ready(metric)
    assert metric.shape == (B, 1)
    assert jnp.allclose(metric, reference(x, y), atol=1e-5, rtol=1e-5)

    # Ragged-batch check: B=10 with b_tile=8 -> cdiv grid of 2 batch tiles,
    # out-of-bounds output rows dropped by Pallas.
    kx2, ky2 = jax.random.split(kx)
    B2, H2, W2 = 10, 10, 10
    x2 = jax.random.normal(kx2, (B2, C, H2, W2), jnp.float32)
    y2 = jax.random.normal(ky2, (B2, C, H2, W2), jnp.float32)
    metric2 = ssp_forward(x2, y2, w1, b1, w2, b2)
    jax.block_until_ready(metric2)
    assert metric2.shape == (B2, 1)
    assert jnp.allclose(metric2, reference(x2, y2), atol=1e-5, rtol=1e-5)

    print("KERNEL_OK")
</pallas_src>

<mosaic_0001>
module attributes {stable_mosaic.version = 11 : i64} {
  func.func @ssp_kernel(%arg0: i32, %arg1: i32, %arg2: memref<2x128x64xf32, #tpu.memory_space<vmem>>, %arg3: memref<2x128x64xf32, #tpu.memory_space<vmem>>, %arg4: memref<128x8xf32, #tpu.memory_space<vmem>>, %arg5: memref<1x8xf32, #tpu.memory_space<vmem>>, %arg6: memref<8x1xf32, #tpu.memory_space<vmem>>, %arg7: memref<1x1xf32, #tpu.memory_space<vmem>>, %arg8: memref<2x1xf32, #tpu.memory_space<vmem>>, %arg9: memref<2x128xf32, #tpu.memory_space<vmem>>) attributes {dimension_semantics = [#tpu.dimension_semantics<parallel>, #tpu.dimension_semantics<arbitrary>], iteration_bounds = array<i64: 1, 1>, scalar_prefetch = 0 : i64, scratch_operands = 1 : i64, tpu.core_type = #tpu.core_type<tc>, window_params = [{transform_indices = @transform_0, window_bounds = array<i64: 2, 128, 64>}, {transform_indices = @transform_1, window_bounds = array<i64: 2, 128, 64>}, {pipeline_mode = #tpu.pipeline_mode<synchronous>, transform_indices = @transform_2, window_bounds = array<i64: 128, 8>}, {pipeline_mode = #tpu.pipeline_mode<synchronous>, transform_indices = @transform_3, window_bounds = array<i64: 1, 8>}, {pipeline_mode = #tpu.pipeline_mode<synchronous>, transform_indices = @transform_4, window_bounds = array<i64: 8, 1>}, {pipeline_mode = #tpu.pipeline_mode<synchronous>, transform_indices = @transform_5, window_bounds = array<i64: 1, 1>}, {transform_indices = @transform_6, window_bounds = array<i64: 2, 1>}]} {
    %c0_i32 = arith.constant 0 : i32
    %0 = arith.cmpi eq, %arg1, %c0_i32 : i32
    %1 = arith.extui %0 : i1 to i32
    %c0_i32_0 = arith.constant 0 : i32
    %2 = arith.cmpi ne, %1, %c0_i32_0 : i32
    scf.if %2 {
      %cst_12 = arith.constant 0.000000e+00 : f32
      %13 = vector.broadcast %cst_12 : f32 to vector<2x128xf32>
      %c0_13 = arith.constant 0 : index
      %c0_14 = arith.constant 0 : index
      %14 = vector.load %arg9[%c0_13, %c0_14] : memref<2x128xf32, #tpu.memory_space<vmem>>, vector<2x128xf32>
      tpu.vector_store %arg9[%c0_13, %c0_14], %13 {strides = array<i32>} : memref<2x128xf32, #tpu.memory_space<vmem>>, vector<2x128xf32>,
    } else {
    }
    %c0 = arith.constant 0 : index
    %c0_1 = arith.constant 0 : index
    %c0_2 = arith.constant 0 : index
    %3 = vector.load %arg2[%c0, %c0_1, %c0_2] : memref<2x128x64xf32, #tpu.memory_space<vmem>>, vector<2x128x64xf32>
    %c0_3 = arith.constant 0 : index
    %c0_4 = arith.constant 0 : index
    %c0_5 = arith.constant 0 : index
    %4 = vector.load %arg3[%c0_3, %c0_4, %c0_5] : memref<2x128x64xf32, #tpu.memory_space<vmem>>, vector<2x128x64xf32>
    %5 = arith.subf %3, %4 : vector<2x128x64xf32>
    %c0_6 = arith.constant 0 : index
    %c0_7 = arith.constant 0 : index
    %6 = vector.load %arg9[%c0_6, %c0_7] : memref<2x128xf32, #tpu.memory_space<vmem>>, vector<2x128xf32>
    %cst = arith.constant dense<0.000000e+00> : vector<2x128xf32>
    %7 = vector.multi_reduction <add>, %5, %cst [2] : vector<2x128x64xf32> to vector<2x128xf32>
    %8 = arith.addf %6, %7 : vector<2x128xf32>
    %c0_8 = arith.constant 0 : index
    %c0_9 = arith.constant 0 : index
    %9 = vector.load %arg9[%c0_8, %c0_9] : memref<2x128xf32, #tpu.memory_space<vmem>>, vector<2x128xf32>
    tpu.vector_store %arg9[%c0_8, %c0_9], %8 {strides = array<i32>} : memref<2x128xf32, #tpu.memory_space<vmem>>, vector<2x128xf32>,
    %c0_i32_10 = arith.constant 0 : i32
    %10 = arith.cmpi eq, %arg1, %c0_i32_10 : i32
    %11 = arith.extui %10 : i1 to i32
    %c0_i32_11 = arith.constant 0 : i32
    %12 = arith.cmpi ne, %11, %c0_i32_11 : i32
    scf.if %12 {
      %c0_12 = arith.constant 0 : index
      %c0_13 = arith.constant 0 : index
      %13 = vector.load %arg9[%c0_12, %c0_13] : memref<2x128xf32, #tpu.memory_space<vmem>>, vector<2x128xf32>
      %14 = math.absf %13 : vector<2x128xf32>
      %cst_14 = arith.constant 1.562500e-02 : f32
      %15 = vector.broadcast %cst_14 : f32 to vector<2x128xf32>
      %16 = arith.mulf %14, %15 : vector<2x128xf32>
      %c0_15 = arith.constant 0 : index
      %c0_16 = arith.constant 0 : index
      %17 = vector.load %arg4[%c0_15, %c0_16] : memref<128x8xf32, #tpu.memory_space<vmem>>, vector<128x8xf32>
      %cst_17 = arith.constant dense<0.000000e+00> : vector<2x8xf32>
      %18 = tpu.matmul %16, %17, %cst_17 {dimension_numbers = #tpu.dot_dimension_numbers<[1], [0], [0], [1], [0, 0, 1, 1], [], []>} : vector<2x128xf32>, vector<128x8xf32>, vector<2x8xf32> -> vector<2x8xf32>
      %c0_18 = arith.constant 0 : index
      %c0_19 = arith.constant 0 : index
      %19 = vector.load %arg5[%c0_18, %c0_19] : memref<1x8xf32, #tpu.memory_space<vmem>>, vector<1x8xf32>
      %20 = vector.broadcast %19 : vector<1x8xf32> to vector<2x8xf32>
      %21 = arith.addf %18, %20 : vector<2x8xf32>
      %cst_20 = arith.constant 0.000000e+00 : f32
      %22 = vector.broadcast %cst_20 : f32 to vector<2x8xf32>
      %23 = arith.maximumf %21, %22 : vector<2x8xf32>
      %c0_21 = arith.constant 0 : index
      %c0_22 = arith.constant 0 : index
      %24 = vector.load %arg6[%c0_21, %c0_22] : memref<8x1xf32, #tpu.memory_space<vmem>>, vector<8x1xf32>
      %cst_23 = arith.constant dense<0.000000e+00> : vector<2x1xf32>
      %25 = tpu.matmul %23, %24, %cst_23 {dimension_numbers = #tpu.dot_dimension_numbers<[1], [0], [0], [1], [0, 0, 1, 1], [], []>} : vector<2x8xf32>, vector<8x1xf32>, vector<2x1xf32> -> vector<2x1xf32>
      %c0_24 = arith.constant 0 : index
      %c0_25 = arith.constant 0 : index
      %26 = vector.load %arg7[%c0_24, %c0_25] : memref<1x1xf32, #tpu.memory_space<vmem>>, vector<1x1xf32>
      %27 = vector.broadcast %26 : vector<1x1xf32> to vector<2x1xf32>
      %28 = arith.addf %25, %27 : vector<2x1xf32>
      %29 = arith.negf %28 : vector<2x1xf32>
      %30 = math.exp %29 : vector<2x1xf32>
      %cst_26 = arith.constant 1.000000e+00 : f32
      %31 = vector.broadcast %cst_26 : f32 to vector<2x1xf32>
      %32 = arith.addf %31, %30 : vector<2x1xf32>
      %33 = arith.divf %31, %32 : vector<2x1xf32>
      %c0_27 = arith.constant 0 : index
      %c0_28 = arith.constant 0 : index
      %34 = vector.load %arg8[%c0_27, %c0_28] : memref<2x1xf32, #tpu.memory_space<vmem>>, vector<2x1xf32>
      tpu.vector_store %arg8[%c0_27, %c0_28], %33 {strides = array<i32>} : memref<2x1xf32, #tpu.memory_space<vmem>>, vector<2x1xf32>,
    } else {
    }
    return
  }
  func.func @transform_0(%arg0: i32, %arg1: i32) -> (i32, i32, i32) {
    %c0_i32 = arith.constant 0 : i32
    %c0_i32_0 = arith.constant 0 : i32
    return %arg0, %c0_i32, %arg1 : i32, i32, i32
  }
  func.func @transform_1(%arg0: i32, %arg1: i32) -> (i32, i32, i32) {
    %c0_i32 = arith.constant 0 : i32
    %c0_i32_0 = arith.constant 0 : i32
    return %arg0, %c0_i32, %arg1 : i32, i32, i32
  }
  func.func @transform_2(%arg0: i32, %arg1: i32) -> (i32, i32) {
    %c0_i32 = arith.constant 0 : i32
    %c0_i32_0 = arith.constant 0 : i32
    %c0_i32_1 = arith.constant 0 : i32
    return %c0_i32, %c0_i32_0 : i32, i32
  }
  func.func @transform_3(%arg0: i32, %arg1: i32) -> (i32, i32) {
    %c0_i32 = arith.constant 0 : i32
    %c0_i32_0 = arith.constant 0 : i32
    %c0_i32_1 = arith.constant 0 : i32
    return %c0_i32, %c0_i32_0 : i32, i32
  }
  func.func @transform_4(%arg0: i32, %arg1: i32) -> (i32, i32) {
    %c0_i32 = arith.constant 0 : i32
    %c0_i32_0 = arith.constant 0 : i32
    %c0_i32_1 = arith.constant 0 : i32
    return %c0_i32, %c0_i32_0 : i32, i32
  }
  func.func @transform_5(%arg0: i32, %arg1: i32) -> (i32, i32) {
    %c0_i32 = arith.constant 0 : i32
    %c0_i32_0 = arith.constant 0 : i32
    %c0_i32_1 = arith.constant 0 : i32
    return %c0_i32, %c0_i32_0 : i32, i32
  }
  func.func @transform_6(%arg0: i32, %arg1: i32) -> (i32, i32) {
    %c0_i32 = arith.constant 0 : i32
    %c0_i32_0 = arith.constant 0 : i32
    return %arg0, %c0_i32 : i32, i32
  }
}

</mosaic_0001>

<bundles_post_ra>
// kernel: tpu_custom_call.1
= control target key start
LH: loop header
LB: loop body
LE: loop exit
PB: predicated region body
PF: predicated region fallthrough
CT: control target
= control target key end

     0   :  { %vm127_vm0 = vcmask 523264   ;;  %vm261_vm1 = vcmask 130112   ;;  %vm265_vm2 = vcmask 195712   ;;  %vm269_vm3 = vcmask 261312   ;;  %s904_s0 = inlined_call_operand.vmem [shape: f32[2,128,64], index: 0, kind: input, shape index: {}]   ;;  %s905_s1 = inlined_call_operand.vmem [shape: f32[2,128,64], index: 1, kind: input, shape index: {}]   ;;  %s906_s3 = inlined_call_operand.vmem [shape: f32[1,8], index: 3, kind: input, shape index: {}]   ;;  %s907_s2 = inlined_call_operand.vmem [shape: f32[128,8], index: 2, kind: input, shape index: {}]   ;;  %s908_s4 = inlined_call_operand.vmem [shape: f32[8,1], index: 4, kind: input, shape index: {}]   ;;  %s909_s5 = inlined_call_operand.<no memory space> [shape: f32[1,1], index: 5, kind: input, shape index: {}]   ;;  %s910_s6 = inlined_call_operand.vmem [shape: f32[2,1], index: 6, kind: output, shape index: {}]  }
   0x1   :  { %v46_v0 = vld [vmem:[%s904_s0 + $0x80] sm:$0xff]  ;;  %v32_v5 = vld [vmem:[%s904_s0 + $0x10] sm:$0xff]  ;;  %v47_v9 = vld [vmem:[%s904_s0 + $0x88] sm:$0xff]  ;;  %vm273_vm4 = vcmask 326912   ;;  %vm277_vm5 = vcmask 392512   ;;  %vm281_vm6 = vcmask 458112  }
   0x2   :  { %v78_v1 = vld [vmem:[%s905_s1 + $0x80] sm:$0xff]  ;;  %v64_v6 = vld [vmem:[%s905_s1 + $0x10] sm:$0xff]  ;;  %v79_v10 = vld [vmem:[%s905_s1 + $0x88] sm:$0xff]  ;;  %vm285_vm7 = vcmask 523712   ;;  %vm289_vm8 = vcmask 589312   ;;  %vm293_vm9 = vcmask 654912  }
   0x3   :  { %v30_v2 = vld [vmem:[%s904_s0] sm:$0xff]  ;;  %v110_v3 = vsub.f32 %v46_v0, %v78_v1  ;;  %v96_v8 = vsub.f32 %v32_v5, %v64_v6  ;;  %v31_v11 = vld [vmem:[%s904_s0 + $0x8] sm:$0xff]  ;;  %v48_v14 = vld [vmem:[%s904_s0 + $0x90] sm:$0xff]  ;;  %v111_v18 = vsub.f32 %v47_v9, %v79_v10  ;;  %vm297_vm10 = vcmask 720512  }
   0x4   :  { %v62_v4 = vld [vmem:[%s905_s1] sm:$0xff]  ;;  %v63_v13 = vld [vmem:[%s905_s1 + $0x8] sm:$0xff]  ;;  %v80_v15 = vld [vmem:[%s905_s1 + $0x90] sm:$0xff]  ;;  %vm301_vm11 = vcmask 786112   ;;  %vm305_vm12 = vcmask 851712   ;;  %vm309_vm13 = vcmask 917312  }
   0x5   :  { %v94_v7 = vsub.f32 %v30_v2, %v62_v4  ;;  %v176_v12 = vsel %vm127_vm0, %v110_v3, 0.0  ;;  %v134_v17 = vsel %vm127_vm0, %v96_v8, 0.0  ;;  %v95_v19 = vsub.f32 %v31_v11, %v63_v13  ;;  %v49_v24 = vld [vmem:[%s904_s0 + $0x98] sm:$0xff]  ;;  %v34_v28 = vld [vmem:[%s904_s0 + $0x20] sm:$0xff]  ;;  %v35_v36 = vld [vmem:[%s904_s0 + $0x28] sm:$0xff] }
   0x6   :  { %177 = vadd.xlane.f32.xlu1 %v176_v12  ;;  %135 = vadd.xlane.f32.xlu2 %v134_v17  ;;  %v112_v20 = vsub.f32 %v48_v14, %v80_v15  ;;  %v179_v21 = vsel %vm127_vm0, %v111_v18, 0.0  ;;  %v81_v25 = vld [vmem:[%s905_s1 + $0x98] sm:$0xff]  ;;  %v66_v29 = vld [vmem:[%s905_s1 + $0x20] sm:$0xff]  ;;  %v67_v37 = vld [vmem:[%s905_s1 + $0x28] sm:$0xff]  ;;  %vm313_vm14 = vcmask 982912   ;;  %vm317_vm15 = vcmask 1048512  }
   0x7   :  { %v128_v16 = vsel %vm127_vm0, %v94_v7, 0.0  ;;  %v131_v22 = vsel %vm127_vm0, %v95_v19, 0.0  ;;  %v33_v26 = vld [vmem:[%s904_s0 + $0x18] sm:$0xff]  ;;  %v113_v30 = vsub.f32 %v49_v24, %v81_v25  ;;  %v98_v32 = vsub.f32 %v34_v28, %v66_v29  ;;  %v50_v38 = vld [vmem:[%s904_s0 + $0xa0] sm:$0xff]  ;;  %v51_v40 = vld [vmem:[%s904_s0 + $0xa8] sm:$0xff] }
   0x8   :  { %129 = vadd.xlane.f32.xlu0 %v128_v16  ;;  %v182_v23 = vsel %vm127_vm0, %v112_v20, 0.0  ;;  %v65_v27 = vld [vmem:[%s905_s1 + $0x18] sm:$0xff]  ;;  %v82_v39 = vld [vmem:[%s905_s1 + $0xa0] sm:$0xff]  ;;  %v83_v41 = vld [vmem:[%s905_s1 + $0xa8] sm:$0xff]  ;;  %v99_v42 = vsub.f32 %v35_v36, %v67_v37 }
   0x9   :  { %v97_v31 = vsub.f32 %v33_v26, %v65_v27  ;;  %v185_v33 = vsel %vm127_vm0, %v113_v30, 0.0  ;;  %v140_v35 = vsel %vm127_vm0, %v98_v32, 0.0  ;;  %v114_v43 = vsub.f32 %v50_v38, %v82_v39  ;;  %v52_v48 = vld [vmem:[%s904_s0 + $0xb0] sm:$0xff]  ;;  %v37_v52 = vld [vmem:[%s904_s0 + $0x38] sm:$0xff]  ;;  %v58_v55 = vld [vmem:[%s904_s0 + $0xe0] sm:$0xff] }
   0xa   :  { %v115_v44 = vsub.f32 %v51_v40, %v83_v41  ;;  %v143_v45 = vsel %vm127_vm0, %v99_v42, 0.0  ;;  %v84_v49 = vld [vmem:[%s905_s1 + $0xb0] sm:$0xff]  ;;  %v69_v53 = vld [vmem:[%s905_s1 + $0x38] sm:$0xff]  ;;  %v90_v56 = vld [vmem:[%s905_s1 + $0xe0] sm:$0xff] }
   0xb   :  { %v137_v34 = vsel %vm127_vm0, %v97_v31, 0.0  ;;  %v188_v46 = vsel %vm127_vm0, %v114_v43, 0.0  ;;  %v36_v50 = vld [vmem:[%s904_s0 + $0x30] sm:$0xff]  ;;  %v116_v54 = vsub.f32 %v52_v48, %v84_v49  ;;  %v101_v58 = vsub.f32 %v37_v52, %v69_v53  ;;  %v38_v60 = vld [vmem:[%s904_s0 + $0x40] sm:$0xff]  ;;  %v53_v4 = vld [vmem:[%s904_s0 + $0xb8] sm:$0xff] }
   0xc   :  { %v191_v47 = vsel %vm127_vm0, %v115_v44, 0.0  ;;  %v68_v51 = vld [vmem:[%s905_s1 + $0x30] sm:$0xff]  ;;  %v122_v59 = vsub.f32 %v58_v55, %v90_v56  ;;  %v70_v63 = vld [vmem:[%s905_s1 + $0x40] sm:$0xff]  ;;  %v43_v6 = vld [vmem:[%s904_s0 + $0x68] sm:$0xff] }
   0xd   :  { %v100_v57 = vsub.f32 %v36_v50, %v68_v51  ;;  %v194_v62 = vsel %vm127_vm0, %v116_v54, 0.0  ;;  %v42_v0 = vld [vmem:[%s904_s0 + $0x60] sm:$0xff]  ;;  %v149_v3 = vsel %vm127_vm0, %v101_v58, 0.0  ;;  %v75_v7 = vld [vmem:[%s905_s1 + $0x68] sm:$0xff]  ;;  %v85_v8 = vld [vmem:[%s905_s1 + $0xb8] sm:$0xff]  ;;  %v102_v13 = vsub.f32 %v38_v60, %v70_v63 }
   0xe   :  { %180 = vadd.xlane.f32.xlu1 %v179_v21  ;;  %183 = vadd.xlane.f32.xlu2 %v182_v23  ;;  %v613_v61 = vsel %vm127_vm0, %v122_v59, 0.0  ;;  %v74_v1 = vld [vmem:[%s905_s1 + $0x60] sm:$0xff]  ;;  %v107_v11 = vsub.f32 %v43_v6, %v75_v7  ;;  %v44_v15 = vld [vmem:[%s904_s0 + $0x70] sm:$0xff]  ;;  %v117_v17 = vsub.f32 %v53_v4, %v85_v8  ;;  %v55_v20 = vld [vmem:[%s904_s0 + $0xc8] sm:$0xff] }
   0xf   :  { %v146_v2 = vsel %vm127_vm0, %v100_v57, 0.0  ;;  %v106_v5 = vsub.f32 %v42_v0, %v74_v1  ;;  %v54_v9 = vld [vmem:[%s904_s0 + $0xc0] sm:$0xff]  ;;  %v76_v16 = vld [vmem:[%s905_s1 + $0x70] sm:$0xff]  ;;  %v87_v23 = vld [vmem:[%s905_s1 + $0xc8] sm:$0xff] }
  0x10   :  { %132 = vadd.xlane.f32.xlu0 %v131_v22  ;;  %v86_v10 = vld [vmem:[%s905_s1 + $0xc0] sm:$0xff]  ;;  %v167_v14 = vsel %vm127_vm0, %v107_v11, 0.0  ;;  %v108_v19 = vsub.f32 %v44_v15, %v76_v16  ;;  %v152_v22 = vsel %vm127_vm0, %v102_v13, 0.0  ;;  %v59_v24 = vld [vmem:[%s904_s0 + $0xe8] sm:$0xff]  ;;  %v197_v26 = vsel %vm127_vm0, %v117_v17, 0.0  ;;  %v60_v30 = vld [vmem:[%s904_s0 + $0xf0] sm:$0xff] }
  0x11   :  { %v646_v12 = vsel %vm127_vm0, %v106_v5, 0.0  ;;  %v118_v18 = vsub.f32 %v54_v9, %v86_v10  ;;  %v91_v25 = vld [vmem:[%s905_s1 + $0xe8] sm:$0xff]  ;;  %v92_v31 = vld [vmem:[%s905_s1 + $0xf0] sm:$0xff]  ;;  %v119_v37 = vsub.f32 %v55_v20, %v87_v23  ;;  %v61_v39 = vld [vmem:[%s904_s0 + $0xf8] sm:$0xff]  ;;  %v256_v23 = vlaneseq }
  0x12   :  { %v170_v21 = vsel %vm127_vm0, %v108_v19, 0.0  ;;  %v39_v28 = vld [vmem:[%s904_s0 + $0x48] sm:$0xff]  ;;  %v123_v29 = vsub.f32 %v59_v24, %v91_v25  ;;  %v93_v40 = vld [vmem:[%s905_s1 + $0xf8] sm:$0xff]  ;;  %v56_v52 = vld [vmem:[%s904_s0 + $0xd0] sm:$0xff] }
  0x13   :  { %v200_v27 = vsel %vm127_vm0, %v118_v18, 0.0  ;;  %v71_v32 = vld [vmem:[%s905_s1 + $0x48] sm:$0xff]  ;;  %v125_v43 = vsub.f32 %v61_v39, %v93_v40  ;;  %v41_v50 = vld [vmem:[%s904_s0 + $0x58] sm:$0xff]  ;;  %v88_v54 = vld [vmem:[%s905_s1 + $0xd0] sm:$0xff] }
  0x14   :  { %v215_v36 = vsel %vm127_vm0, %v123_v29, 0.0  ;;  %v103_v41 = vsub.f32 %v39_v28, %v71_v32  ;;  %v73_v51 = vld [vmem:[%s905_s1 + $0x58] sm:$0xff]  ;;  %v120_v59 = vsub.f32 %v56_v52, %v88_v54  ;;  %v375_v16 = vld [vmem:[%s907_s2 + $0x70] sm:$0xff]  ;;  %v374_v17 = vld [vmem:[%s907_s2 + $0x68] sm:$0xff]  ;;  %v790_v28 = vand.u32 127, %v256_v23 }
  0x15   :  { %v221_v44 = vsel %vm127_vm0, %v125_v43, 0.0  ;;  %v57_v55 = vld [vmem:[%s904_s0 + $0xd8] sm:$0xff]  ;;  %v105_v58 = vsub.f32 %v41_v50, %v73_v51  ;;  %v371_v24 = vld [vmem:[%s907_s2 + $0x50] sm:$0xff]  ;;  %v370_v25 = vld [vmem:[%s907_s2 + $0x48] sm:$0xff] }
  0x16   :  { %186 = vadd.xlane.f32.xlu1 %v185_v33  ;;  %141 = vadd.xlane.f32.xlu2 %v140_v35  ;;  %v40_v33 = vld [vmem:[%s904_s0 + $0x50] sm:$0xff]  ;;  %v124_v35 = vsub.f32 %v60_v30, %v92_v31  ;;  %v155_v48 = vsel %vm127_vm0, %v103_v41, 0.0  ;;  %v89_v56 = vld [vmem:[%s905_s1 + $0xd8] sm:$0xff]  ;;  %v206_v63 = vsel %vm127_vm0, %v120_v59, 0.0  ;;  %v369_v31 = vld [vmem:[%s907_s2 + $0x40] sm:$0xff]  ;;  %v259_v32 = vadd.s32 4294967288, %v790_v28 }
  0x17   :  { %v121_v60 = vsub.f32 %v57_v55, %v89_v56  ;;  %v376_v15 = vld [vmem:[%s907_s2 + $0x78] sm:$0xff]  ;;  %v366_v40 = vld [vmem:[%s907_s2 + $0x28] sm:$0xff]  ;;  %v365_v41 = vld [vmem:[%s907_s2 + $0x20] sm:$0xff]  ;;  %v275_v51 = vadd.s32 4294967256, %v790_v28  ;;  %v279_v55 = vadd.s32 4294967248, %v790_v28  ;;  %v283_v59 = vadd.s32 4294967240, %v790_v28 }
  0x18   :  { %138 = vadd.xlane.f32.xlu0 %v137_v34  ;;  %v72_v34 = vld [vmem:[%s905_s1 + $0x50] sm:$0xff]  ;;  %v218_v38 = vsel %vm127_vm0, %v124_v35, 0.0  ;;  %381 = vmatpush.msra.mxu0 %v376_v15 }
  0x19   :  { %v104_v42 = vsub.f32 %v40_v33, %v72_v34  ;;  %v209_v0 = vsel %vm127_vm0, %v121_v60, 0.0  ;;  %v368_v33 = vld [vmem:[%s907_s2 + $0x38] sm:$0xff]  ;;  %v367_v34 = vld [vmem:[%s907_s2 + $0x30] sm:$0xff]  ;;  %v287_v60 = vadd.s32 4294967232, %v790_v28 }
  0x1a   :  { %382 = vmatpush.msra.mxu0 %v375_v16  ;;  %v363_v56 = vld [vmem:[%s907_s2 + $0x10] sm:$0xff] }
  0x1b   :  { %v158_v49 = vsel %vm127_vm0, %v104_v42, 0.0 }
  0x1c   :  { %383 = vmatpush.msra.mxu0 %v374_v17  ;;  %v295_v17 = vadd.s32 4294967216, %v790_v28 }
  0x1e   :  { %144 = vadd.xlane.f32.xlu1 %v143_v45  ;;  %192 = vadd.xlane.f32.xlu2 %v191_v47  ;;  %v203_v45 = vsel %vm127_vm0, %v119_v37, 0.0  ;;  %v77_v47 = vld [vmem:[%s905_s1 + $0x78] sm:$0xff]  ;;  %v263_v37 = vadd.s32 4294967280, %v790_v28 }
  0x20   :  { %189 = vadd.xlane.f32.xlu0 %v188_v46  ;;  %v45_v46 = vld [vmem:[%s904_s0 + $0x78] sm:$0xff] }
  0x21   :  { %v109_v53 = vsub.f32 %v45_v46, %v77_v47  ;;  %v271_v47 = vadd.s32 4294967264, %v790_v28 }
  0x23   :  { %v173_v57 = vsel %vm127_vm0, %v109_v53, 0.0 }
  0x26   :  { %195 = vadd.xlane.f32.xlu1 %v194_v62  ;;  %150 = vadd.xlane.f32.xlu2 %v149_v3  ;;  %v161_v62 = vsel %vm127_vm0, %v105_v58, 0.0  ;;  %vm350_vm0 = vcmask 1041409  }
  0x28   :  { %147 = vadd.xlane.f32.xlu0 %v146_v2 }
  0x2e   :  { %153 = vadd.xlane.f32.xlu1 %v152_v22  ;;  %201 = vadd.xlane.f32.xlu2 %v200_v27  ;;  %v372_v22 = vld [vmem:[%s907_s2 + $0x58] sm:$0xff] }
  0x30   :  { %198 = vadd.xlane.f32.xlu0 %v197_v26  ;;  %v465_v26 = vmov 0.0  }
  0x31   :  { %29 = vst [vmem:[#allocation2] sm:$0x3] %v465_v26 }
  0x36   :  { %204 = vadd.xlane.f32.xlu1 %v203_v45  ;;  %159 = vadd.xlane.f32.xlu2 %v158_v49 }
  0x38   :  { %156 = vadd.xlane.f32.xlu0 %v155_v48  ;;  %v364_v48 = vld [vmem:[%s907_s2 + $0x18] sm:$0xff] }
  0x3e   :  { %162 = vadd.xlane.f32.xlu1 %v161_v62  ;;  %210 = vadd.xlane.f32.xlu2 %v209_v0  ;;  %v362_v62 = vld [vmem:[%s907_s2 + $0x8] sm:$0xff] }
  0x40   :  { %207 = vadd.xlane.f32.xlu0 %v206_v63 }
  0x46   :  { %213 = vadd.xlane.f32.xlu1 %v613_v61  ;;  %168 = vadd.xlane.f32.xlu2 %v167_v14 }
  0x48   :  { %165 = vadd.xlane.f32.xlu0 %v646_v12 }
  0x4e   :  { %171 = vadd.xlane.f32.xlu1 %v170_v21  ;;  %219 = vadd.xlane.f32.xlu2 %v218_v38  ;;  %v373_v21 = vld [vmem:[%s907_s2 + $0x60] sm:$0xff] }
  0x4f   :  { %384 = vmatpush.msra.mxu0 %v373_v21  ;;  %v299_v21 = vadd.s32 4294967208, %v790_v28 }
  0x50   :  { %216 = vadd.xlane.f32.xlu0 %v215_v36  ;;  %v267_v36 = vadd.s32 4294967272, %v790_v28 }
  0x51   :  { %385 = vmatpush.msra.mxu0 %v372_v22 }
  0x53   :  { %386 = vmatpush.msra.mxu0 %v371_v24 }
  0x55   :  { %387 = vmatpush.msra.mxu0 %v370_v25 }
  0x56   :  { %222 = vadd.xlane.f32.xlu1 %v221_v44 }
  0x57   :  { %388 = vmatpush.msra.mxu0 %v369_v31 }
  0x58   :  { %174 = vadd.xlane.f32.xlu0 %v173_v57 }
  0x59   :  { %389 = vmatpush.msra.mxu0 %v368_v33 }
  0x5b   :  { %390 = vmatpush.msra.mxu0 %v367_v34  ;;  %v303_v34 = vadd.s32 4294967200, %v790_v28 }
  0x5d   :  { %391 = vmatpush.msra.mxu0 %v366_v40 }
  0x5f   :  { %392 = vmatpush.msra.mxu0 %v365_v41 }
  0x61   :  { %393 = vmatpush.msra.mxu0 %v364_v48 }
  0x63   :  { %394 = vmatpush.msra.mxu0 %v363_v56 }
  0x65   :  { %395 = vmatpush.msra.mxu0 %v362_v62 }
  0x79   :  { %v731_v1 = vpop.xlane.xlu1 %177  ;;  %v735_v3 = vpop.xlane.xlu2 %135 }
  0x7a   :  { %v319_v42 = vperm.slane %v731_v1, %v790_v28  ;;  %v264_v57 = vperm.slane %v735_v3, %v263_v37 }
  0x7b   :  { %v733_v2 = vpop.xlane.xlu0 %129 }
  0x7c   :  { %v258_v45 = vperm.slane %v733_v2, %v790_v28 }
  0x81   :  { %v737_v4 = vpop.xlane.xlu1 %180  ;;  %v741_v6 = vpop.xlane.xlu2 %183 }
  0x82   :  { %v320_v35 = vperm.slane %v737_v4, %v259_v32  ;;  %v322_v46 = vperm.slane %v741_v6, %v263_v37 }
  0x83   :  { %v739_v5 = vpop.xlane.xlu0 %132 }
  0x84   :  { %v260_v38 = vperm.slane %v739_v5, %v259_v32  ;;  %v321_v49 = vsel %vm261_vm1, %v320_v35, %v319_v42  ;;  %v307_v35 = vadd.s32 4294967192, %v790_v28 }
  0x85   :  { %v323_v58 = vsel %vm265_vm2, %v322_v46, %v321_v49 }
  0x86   :  { %v262_v52 = vsel %vm261_vm1, %v260_v38, %v258_v45  ;;  %vm407_vm1 = vcmask 64512  }
  0x87   :  { %v266_v0 = vsel %vm265_vm2, %v264_v57, %v262_v52 }
  0x89   :  { %v743_v61 = vpop.xlane.xlu1 %186  ;;  %v747_v8 = vpop.xlane.xlu2 %141 }
  0x8a   :  { %v324_v50 = vperm.slane %v743_v61, %v267_v36  ;;  %v272_v1 = vperm.slane %v747_v8, %v271_v47 }
  0x8b   :  { %v745_v7 = vpop.xlane.xlu0 %138 }
  0x8c   :  { %v268_v53 = vperm.slane %v745_v7, %v267_v36  ;;  %v325_v63 = vsel %vm269_vm3, %v324_v50, %v323_v58  ;;  %v361_v7 = vld [vmem:[%s907_s2] sm:$0xff] }
  0x8d   :  { %396 = vmatpush.msra.mxu0 %v361_v7  ;;  %v11_v7 = vstv %s909_s5 }
  0x8e   :  { %v270_v3 = vsel %vm269_vm3, %v268_v53, %v266_v0  ;;  %12 = vst [vmem:[#allocation3] sm:$0x1] %v11_v7 }
  0x91   :  { %v749_v9 = vpop.xlane.xlu1 %144  ;;  %v753_v11 = vpop.xlane.xlu2 %192 }
  0x92   :  { %v328_v2 = vperm.slane %v753_v11, %v275_v51  ;;  %v276_v4 = vperm.slane %v749_v9, %v275_v51  ;;  %v291_v11 = vadd.s32 4294967224, %v790_v28  ;;  %v274_v9 = vsel %vm273_vm4, %v272_v1, %v270_v3 }
  0x93   :  { %v751_v10 = vpop.xlane.xlu0 %189 }
  0x94   :  { %v326_v54 = vperm.slane %v751_v10, %v271_v47 }
  0x96   :  { %v327_v5 = vsel %vm273_vm4, %v326_v54, %v325_v63 }
  0x99   :  { %v755_v12 = vpop.xlane.xlu1 %195  ;;  %v759_v14 = vpop.xlane.xlu2 %150 }
  0x9a   :  { %v330_v6 = vperm.slane %v755_v12, %v279_v55  ;;  %v329_v12 = vsel %vm277_vm5, %v328_v2, %v327_v5  ;;  %v284_v22 = vperm.slane %v759_v14, %v283_v59 }
  0x9b   :  { %v757_v13 = vpop.xlane.xlu0 %147 }
  0x9c   :  { %v280_v10 = vperm.slane %v757_v13, %v279_v55  ;;  %v278_v13 = vsel %vm277_vm5, %v276_v4, %v274_v9  ;;  %vm450_vm5 = vcmask 1024  }
  0x9e   :  { %v282_v24 = vsel %vm281_vm6, %v280_v10, %v278_v13  ;;  %v459_v10 = vld [vmem:[%s906_s3] ss:$0 sm:$0xff] }
  0x9f   :  { %v286_v14 = vsel %vm285_vm7, %v284_v22, %v282_v24 }
  0xa1   :  { %v770_v18 = vpop.xlane.xlu1 %153  ;;  %v774_v20 = vpop.xlane.xlu2 %201 }
  0xa2   :  { %v334_v23 = vperm.slane %v774_v20, %v287_v60  ;;  %v288_v25 = vperm.slane %v770_v18, %v287_v60  ;;  %v311_v18 = vadd.s32 4294967184, %v790_v28 }
  0xa3   :  { %v772_v19 = vpop.xlane.xlu0 %198 }
  0xa4   :  { %v332_v8 = vperm.slane %v772_v19, %v283_v59  ;;  %v331_v19 = vsel %vm281_vm6, %v330_v6, %v329_v12 }
  0xa6   :  { %v333_v26 = vsel %vm285_vm7, %v332_v8, %v331_v19 }
  0xa7   :  { %v335_v20 = vsel %vm289_vm8, %v334_v23, %v333_v26 }
  0xa9   :  { %v788_v27 = vpop.xlane.xlu1 %204  ;;  %v794_v30 = vpop.xlane.xlu2 %159 }
  0xaa   :  { %v336_v31 = vperm.slane %v788_v27, %v291_v11  ;;  %v290_v27 = vsel %vm289_vm8, %v288_v25, %v286_v14 }
  0xab   :  { %v792_v29 = vpop.xlane.xlu0 %156 }
  0xac   :  { %v292_v32 = vperm.slane %v792_v29, %v291_v11  ;;  %v337_v37 = vsel %vm293_vm9, %v336_v31, %v335_v20  ;;  %v296_v29 = vperm.slane %v794_v30, %v295_v17  ;;  %v315_v30 = vadd.s32 4294967176, %v790_v28  ;;  %v126_v28 = vld [vmem:[#allocation2] sm:$0x3] }
  0xae   :  { %v294_v41 = vsel %vm293_vm9, %v292_v32, %v290_v27 }
  0xaf   :  { %v298_v49 = vsel %vm297_vm10, %v296_v29, %v294_v41 }
  0xb1   :  { %v810_v39 = vpop.xlane.xlu1 %162  ;;  %v822_v44 = vpop.xlane.xlu2 %210 }
  0xb2   :  { %v340_v38 = vperm.slane %v822_v44, %v299_v21  ;;  %v300_v42 = vperm.slane %v810_v39, %v299_v21 }
  0xb3   :  { %v820_v43 = vpop.xlane.xlu0 %207 }
  0xb4   :  { %v338_v33 = vperm.slane %v820_v43, %v295_v17  ;;  %v302_v44 = vsel %vm301_vm11, %v300_v42, %v298_v49 }
  0xb6   :  { %v339_v43 = vsel %vm297_vm10, %v338_v33, %v337_v37 }
  0xb7   :  { %v341_v50 = vsel %vm301_vm11, %v340_v38, %v339_v43 }
  0xb9   :  { %v214_v61 = vpop.xlane.xlu1 %213  ;;  %v169_v16 = vpop.xlane.xlu2 %168 }
  0xba   :  { %v342_v45 = vperm.slane %v214_v61, %v303_v34  ;;  %v308_v52 = vperm.slane %v169_v16, %v307_v35  ;;  %v402_v61 = vld [vmem:[%s908_s4] sm:$0xff] }
  0xbb   :  { %v166_v15 = vpop.xlane.xlu0 %165  ;;  %426 = vmatpush.msra.mxu1 %v402_v61  ;;  %v460_v16 = vld [vmem:[#allocation3] ss:$0 sm:$0xff] }
  0xbc   :  { %v304_v46 = vperm.slane %v166_v15, %v303_v34  ;;  %v343_v51 = vsel %vm305_vm12, %v342_v45, %v341_v50 }
  0xbe   :  { %v306_v39 = vsel %vm305_vm12, %v304_v46, %v302_v44 }
  0xbf   :  { %v310_v59 = vsel %vm309_vm13, %v308_v52, %v306_v39 }
  0xc1   :  { %v172_v36 = vpop.xlane.xlu1 %171  ;;  %v220_v48 = vpop.xlane.xlu2 %219 }
  0xc2   :  { %v346_v53 = vperm.slane %v220_v48, %v311_v18  ;;  %v312_v54 = vperm.slane %v172_v36, %v311_v18 }
  0xc3   :  { %v217_v40 = vpop.xlane.xlu0 %216 }
  0xc4   :  { %v344_v47 = vperm.slane %v217_v40, %v307_v35  ;;  %v314_v63 = vsel %vm313_vm14, %v312_v54, %v310_v59 }
  0xc6   :  { %v345_v55 = vsel %vm309_vm13, %v344_v47, %v343_v51 }
  0xc7   :  { %v347_v60 = vsel %vm313_vm14, %v346_v53, %v345_v55 }
  0xc9   :  { %v223_v56 = vpop.xlane.xlu1 %222 }
  0xca   :  { %v348_v57 = vperm.slane %v223_v56, %v315_v30 }
  0xcb   :  { %v175_v58 = vpop.xlane.xlu0 %174 }
  0xcc   :  { %v316_v62 = vperm.slane %v175_v58, %v315_v30  ;;  %v349_v0 = vsel %vm317_vm15, %v348_v57, %v347_v60 }
  0xce   :  { %v318_v1 = vsel %vm317_vm15, %v316_v62, %v314_v63 }
  0xcf   :  { %v351_v2 = vsel %vm350_vm0, %v349_v0, %v318_v1 }
  0xd0   :  { %v353_v3 = vadd.f32 %v351_v2, %v126_v28 }
  0xd2   :  { %354 = vst [vmem:[#allocation2] sm:$0x3] %v353_v3 }
  0xd9   :  { %v358_v4 = vld [vmem:[#allocation2] sm:$0x3] }
  0xda   :  { %v359_v5 = vand.u32 2147483647, %v358_v4 }
  0xdc   :  { %v360_v6 = vmul.f32 0.015625, %v359_v5 }
  0xde   :  { %397 = vmatmul.f32.vlgmr.msra.gmra.mxu0 %v360_v6 }
 0x15b   :  { %v398_v8 = vpop.f32.mrf.mxu0 }
 0x15c   :  { %v399_v11 = vadd.f32 %v459_v10, %v398_v8 }
 0x15e   :  { %v401_v15 = vmax.f32 %v399_v11, 0.0 }
 0x160   :  { %456 = vmatmul.msk.f32.vlgmr.msra.gmra.mxu1 %vm407_vm1, %v401_v15 }
 0x1dd   :  { %v428_v9 = vpop.f32.mrf.mxu1 }
 0x1de   :  { %v429_v12 = vadd.f32 %v460_v16, %v428_v9 }
 0x1e0   :  { %v457_v17 = vmul.f32 -1.442695, %v429_v12 }
 0x1e2   :  { %461 = vpow2.f32 %v457_v17 }
 0x1e8   :  { %v462_v21 = vpop.eup %461 }
 0x1e9   :  { %v434_v13 = vadd.f32 1.0, %v462_v21 }
 0x1eb   :  { %463 = vrcp.f32 %v434_v13  ;;  %v446_v24 = vand.u32 2147483648, %v434_v13  ;;  %v444_v26 = vand.u32 2147483647, %v434_v13  ;;  %vm440_vm3 = vweird.f32 %v434_v13 }
 0x1ed   :  { %v447_v32 = vor.u32 1.1754944e-38, %v446_v24  ;;  %vm445_vm6 = vcmp.eq.f32.partialorder %v444_v26, 8.507059e+37 }
 0x1f1   :  { %v464_v19 = vpop.eup %463 }
 0x1f2   :  { %v436_v22 = vmul.f32 %v464_v19, %v434_v13  ;;  %vm441_vm2 = vweird.f32 %v464_v19 }
 0x1f3   :  { %vm442_vm4 = vmor %vm440_vm3, %vm441_vm2 }
 0x1f4   :  { %v437_v23 = vsub.f32 1.0, %v436_v22 }
 0x1f6   :  { %v438_v25 = vmul.f32 %v464_v19, %v437_v23 }
 0x1f8   :  { %v439_v31 = vadd.f32 %v464_v19, %v438_v25 }
 0x1fa   :  { %v443_v33 = vsel %vm442_vm4, %v464_v19, %v439_v31 }
 0x1fb   :  { %v448_v34 = vsel %vm445_vm6, %v447_v32, %v443_v33 }
 0x1fc   :  { %451 = vst.msk [vmem:[%s910_s6] sm:$0x3] %vm450_vm5, %v448_v34 }

</bundles_post_ra>
